<compile_context>
chip_gen: v6e
topology: v6e:2x2x1
jax: 0.10.0
libtpu: 0.0.40
codegen_flags: <defaults>
</compile_context>

<pallas_src>
import functools

import jax
import jax.numpy as jnp
import numpy as np
from jax import lax
from jax.experimental import pallas as pl
from jax.experimental.pallas import tpu as pltpu


def _round_up(x, m):
    return ((x + m - 1) // m) * m


def _soft_cindex_kernel(k_start_ref, k_fast_ref,
                        a_col_ref, t_col_ref, e_col_ref,
                        t_row_ref, e_row_ref,
                        out_ref, den_acc, numt_acc, *, gj_full):
    i = pl.program_id(0)
    gj = t_row_ref.shape[0]            # static number of k tiles

    den_acc[...] = jnp.zeros_like(den_acc)
    numt_acc[...] = jnp.zeros_like(numt_acc)

    tj = t_col_ref[...]                # (tm, 1)  event_time[j] (sorted, pads = +big)
    aj = a_col_ref[...]                # (tm, 1)  0.5 * event_indicator[j] * weights[j]
    aj2 = aj + aj                      # (tm, 1)  event_indicator[j] * weights[j]
    ej = e_col_ref[...]                # (tm, 1)  estimate[j] / (2*sigma)
    sum_a = jnp.sum(aj)                # scalar   (pads contribute 0)
    two_sum_a = sum_a + sum_a

    k0 = k_start_ref[i]                # first comparable k tile for this row tile
    k_fast = k_fast_ref[i]             # first strictly-comparable (all pairs strict) k tile

    def body(k, carry):
        tk = t_row_ref[k]              # (1, tn)  event_time[k] (sorted, pads = -big)
        ek = e_row_ref[k]              # (1, tn)  estimate[k] / (2*sigma)
        th = jnp.tanh(ek - ej)         # (tm, tn) ; sigmoid((est_k-est_j)/sigma) = 0.5*(1+th)
        is_fast = jnp.logical_and(k >= k_fast, k < gj_full)

        @pl.when(is_fast)
        def _fast():
            # every real pair strict (weight 2*a_j); no padded columns in this tile.
            den_acc[...] += two_sum_a
            numt_acc[...] += jnp.sum(aj2 * th, axis=0, keepdims=True)

        @pl.when(jnp.logical_not(is_fast))
        def _slow():
            # 2*a_j on strict "<", a_j on tie, 0 otherwise (pads -> 0 on either side)
            wa = jnp.where(tj < tk, aj2, jnp.where(tj == tk, aj, jnp.float32(0.0)))
            den_acc[...] += jnp.sum(wa, axis=0, keepdims=True)
            numt_acc[...] += jnp.sum(wa * th, axis=0, keepdims=True)

        return carry

    lax.fori_loop(k0, gj, body, jnp.int32(0))

    # lane-dense packed partials: row 0 = sum(wa), row 1 = sum(wa*tanh)
    out_ref[:, 0:1, :] = den_acc[...][None]
    out_ref[:, 1:2, :] = numt_acc[...][None]


def soft_cindex_censored_loss(event_indicator, event_time, estimate, sigma=0.1,
                              weights=None, tile_m=512, tile_n=1024):
    """Harrell soft C-index loss (IPCW per-sample weights may be passed via `weights`)."""
    # TODO(synk): the 'ipcw' branch needs a CensoringDistributionEstimator fit on training
    # data (host-side Kaplan-Meier); only the resulting per-sample weights are consumed
    # here, identical to how the torch forward consumes them.
    n = int(event_time.shape[0])
    f32 = jnp.float32
    ind = event_indicator.astype(f32)
    t = event_time.astype(f32)
    est = estimate.astype(f32)
    if weights is None:                       # Harrell: weights = ones_like(time)
        weights = jnp.ones_like(t)
    w = weights.astype(f32)

    # Hoisted per-row factor and estimate scaling (sigmoid(x) = 0.5*(1 + tanh(x/2))).
    a = 0.5 * ind * w
    est_s = est * (1.0 / (2.0 * float(sigma)))

    # Sort by event_time so lower-triangle k tiles can be skipped / fast-pathed.
    order = jnp.argsort(t)
    t_s, a_s, e_s = t[order], a[order], est_s[order]

    tm = _round_up(min(int(tile_m), _round_up(n, 8)), 8)
    tn = _round_up(min(int(tile_n), _round_up(n, 128)), 128)
    n_rows = _round_up(n, tm)
    n_cols = _round_up(n, tn)
    gi, gj = n_rows // tm, n_cols // tn
    pad_r, pad_c = n_rows - n, n_cols - n

    big = float(np.finfo(np.float32).max)

    # ---- static per-tile index arithmetic (host numpy) + value-based tile bounds ----
    rows0 = np.arange(gi) * tm
    row_last = np.minimum(rows0 + tm, n) - 1
    cols0 = np.arange(gj) * tn
    col_last = np.minimum(cols0 + tn, n) - 1
    col_full = (cols0 + tn) <= n              # k tiles with no padded columns (a prefix)
    gj_full = int(np.sum(col_full))

    t_col_min = t_s[rows0]                    # (gi,) first (real) time in each row tile
    t_col_max = t_s[row_last]                 # (gi,) last real time in each row tile
    t_row_max = t_s[col_last]                 # (gj,) last real time in each k tile

    # First comparable k tile (tiles entirely below the row tile carry zero weight).
    # Value-based, so ties straddling a tile boundary are kept (not skipped).
    k_start = jnp.sum(t_row_max[None, :] < t_col_min[:, None], axis=1).astype(jnp.int32)
    # First strictly-comparable full k tile (its min time > row tile's max time).
    if gj_full > 0:
        starts_full = t_s[cols0[:gj_full]]
        k_fast = jnp.sum(starts_full[None, :] <= t_col_max[:, None], axis=1).astype(jnp.int32)
    else:
        k_fast = jnp.zeros((gi,), jnp.int32)

    # ---- padding: column view pads keep sortedness / zero weight; row view pads ----
    # ---- use -big so cmpf == 0 against every real j in the slow path.           ----
    t_col = jnp.pad(t_s, (0, pad_r), constant_values=big)
    a_col = jnp.pad(a_s, (0, pad_r))
    e_col = jnp.pad(e_s, (0, pad_r))
    t_row = jnp.pad(t_s, (0, pad_c), constant_values=-big)
    e_row = jnp.pad(e_s, (0, pad_c))

    # ---- heavy/light interleave of row tiles: balances triangular work when the ----
    # ---- "parallel" row-tile axis is split contiguously across v7x's 2 cores.   ----
    perm = np.empty(gi, dtype=np.int64)
    nh = (gi + 1) // 2
    perm[0::2] = np.arange(nh)
    perm[1::2] = np.arange(gi - 1, nh - 1, -1)

    def _blockperm(x):
        return x.reshape(gi, tm)[perm].reshape(n_rows)

    t_col = _blockperm(t_col).reshape(n_rows, 1)
    a_col = _blockperm(a_col).reshape(n_rows, 1)
    e_col = _blockperm(e_col).reshape(n_rows, 1)
    k_start = k_start[perm]
    k_fast = k_fast[perm]

    t_row3 = t_row.reshape(gj, 1, tn)         # full row view stays VMEM-resident
    e_row3 = e_row.reshape(gj, 1, tn)

    out = pl.pallas_call(
        functools.partial(_soft_cindex_kernel, gj_full=gj_full),
        out_shape=jax.ShapeDtypeStruct((gi, 2, tn), f32),
        grid_spec=pltpu.PrefetchScalarGridSpec(
            num_scalar_prefetch=2,
            grid=(gi,),
            in_specs=[pl.BlockSpec((tm, 1), lambda i, ks, kf: (i, 0)),       # a_col
                      pl.BlockSpec((tm, 1), lambda i, ks, kf: (i, 0)),       # t_col
                      pl.BlockSpec((tm, 1), lambda i, ks, kf: (i, 0)),       # e_col
                      pl.BlockSpec((gj, 1, tn), lambda i, ks, kf: (0, 0, 0)),  # t_row
                      pl.BlockSpec((gj, 1, tn), lambda i, ks, kf: (0, 0, 0))],  # e_row
            out_specs=pl.BlockSpec((1, 2, tn), lambda i, ks, kf: (i, 0, 0)),
            scratch_shapes=[pltpu.VMEM((1, tn), f32),
                            pltpu.VMEM((1, tn), f32)]),
        compiler_params=pltpu.CompilerParams(
            dimension_semantics=("parallel",),
            vmem_limit_bytes=32 * 1024 * 1024),
    )(k_start, k_fast, a_col, t_col, e_col, t_row3, e_row3)

    den_raw = jnp.sum(out[:, 0, :])
    numt_raw = jnp.sum(out[:, 1, :])
    num_raw = 0.5 * (den_raw + numt_raw)      # sum of sigmoid * W (diag still included)

    # Diagonal correction (replaces the -0.5*eye term): each real sample adds
    # sigmoid(0)=0.5 times weight 0.5*e_j*w_j to num and 0.5*e_j*w_j to den.
    diag = jnp.sum(a)                         # = 0.5 * sum(event_indicator * weights)
    num = num_raw - 0.5 * diag
    den = den_raw - diag
    # den == 0 (no comparable off-diagonal pairs) -> 0/0 = NaN like the reference.
    # (Tiny-residual edge case when the true den is 0 is acknowledged; kept simple.)
    return jnp.where(den > 0, num / den, jnp.float32(jnp.nan))


def _reference_numpy(event_indicator, event_time, estimate, sigma=0.1):
    """Direct numpy transcription of the PyTorch module (Harrell)."""
    ei = np.asarray(event_indicator, dtype=np.float64)
    t = np.asarray(event_time, dtype=np.float64)
    est = np.asarray(estimate, dtype=np.float64)
    n = t.shape[0]
    weights = np.ones_like(t)
    wweights = np.repeat(weights, n).reshape(n, n)
    weightsj = np.repeat(t, n).reshape(n, n)
    weightsk = np.tile(t, n).reshape(n, n)
    weightsI = (weightsj == weightsk) * 0.5 + (weightsj < weightsk) - np.eye(n) * 0.5
    censored_id = np.repeat(ei, n).reshape(n, n)
    wweights = censored_id * weightsI * wweights
    wweights = wweights / np.sum(wweights)
    etak = est.reshape(-1, 1).repeat(n, axis=1)
    etaj = est.reshape(1, -1).repeat(n, axis=0)
    sig = 1.0 / (1.0 + np.exp(-(etaj - etak) / sigma))
    return float(np.sum(sig * wweights))


if __name__ == "__main__":
    key = jax.random.PRNGKey(0)
    # n=8 / n=300: single-tile and padded single-tile cases with default tiles.
    # n=600 with 128x128 tiles: multi-tile triangular skip, strict fast path,
    # padded last k tile and row-tile interleave permutation all exercised.
    configs = [(8, {}), (300, {}), (600, dict(tile_m=128, tile_n=128))]
    for n, kw in configs:
        k1, k2, k3, key = jax.random.split(key, 4)
        event_time = jax.random.uniform(k1, (n,), dtype=jnp.float32) * 10.0
        estimate = jax.random.normal(k2, (n,), dtype=jnp.float32)
        event_indicator = jax.random.bernoulli(k3, 0.6, (n,)).astype(jnp.float32)
        # Guarantee at least one comparable pair (nonzero denominator).
        event_indicator = event_indicator.at[jnp.argmin(event_time)].set(1.0)

        cindex = soft_cindex_censored_loss(event_indicator, event_time, estimate,
                                           sigma=0.1, **kw)
        cindex = jax.block_until_ready(cindex)

        ref = _reference_numpy(np.array(event_indicator), np.array(event_time),
                               np.array(estimate), sigma=0.1)
        assert np.allclose(float(cindex), ref, rtol=2e-4, atol=1e-5), (n, float(cindex), ref)

    print("KERNEL_OK")
</pallas_src>

<mosaic_0001>
module attributes {stable_mosaic.version = 11 : i64} {
  func.func @_soft_cindex_kernel(%arg0: i32, %arg1: memref<1xi32, #tpu.memory_space<smem>>, %arg2: memref<1xi32, #tpu.memory_space<smem>>, %arg3: memref<8x1xf32, #tpu.memory_space<vmem>>, %arg4: memref<8x1xf32, #tpu.memory_space<vmem>>, %arg5: memref<8x1xf32, #tpu.memory_space<vmem>>, %arg6: memref<1x1x128xf32, #tpu.memory_space<vmem>>, %arg7: memref<1x1x128xf32, #tpu.memory_space<vmem>>, %arg8: memref<1x2x128xf32, #tpu.memory_space<vmem>>, %arg9: memref<1x128xf32, #tpu.memory_space<vmem>>, %arg10: memref<1x128xf32, #tpu.memory_space<vmem>>) attributes {dimension_semantics = [#tpu.dimension_semantics<parallel>], iteration_bounds = array<i64: 1>, scalar_prefetch = 2 : i64, scratch_operands = 2 : i64, tpu.core_type = #tpu.core_type<tc>, window_params = [{transform_indices = @transform_0, window_bounds = array<i64: 8, 1>}, {transform_indices = @transform_1, window_bounds = array<i64: 8, 1>}, {transform_indices = @transform_2, window_bounds = array<i64: 8, 1>}, {pipeline_mode = #tpu.pipeline_mode<synchronous>, transform_indices = @transform_3, window_bounds = array<i64: 1, 1, 128>}, {pipeline_mode = #tpu.pipeline_mode<synchronous>, transform_indices = @transform_4, window_bounds = array<i64: 1, 1, 128>}, {transform_indices = @transform_5, window_bounds = array<i64: 1, 2, 128>}]} {
    %cst = arith.constant 0.000000e+00 : f32
    %0 = vector.broadcast %cst : f32 to vector<1x128xf32>
    %c0 = arith.constant 0 : index
    %c0_0 = arith.constant 0 : index
    %1 = vector.load %arg9[%c0, %c0_0] : memref<1x128xf32, #tpu.memory_space<vmem>>, vector<1x128xf32>
    tpu.vector_store %arg9[%c0, %c0_0], %0 {strides = array<i32>} : memref<1x128xf32, #tpu.memory_space<vmem>>, vector<1x128xf32>,
    %cst_1 = arith.constant 0.000000e+00 : f32
    %2 = vector.broadcast %cst_1 : f32 to vector<1x128xf32>
    %c0_2 = arith.constant 0 : index
    %c0_3 = arith.constant 0 : index
    %3 = vector.load %arg10[%c0_2, %c0_3] : memref<1x128xf32, #tpu.memory_space<vmem>>, vector<1x128xf32>
    tpu.vector_store %arg10[%c0_2, %c0_3], %2 {strides = array<i32>} : memref<1x128xf32, #tpu.memory_space<vmem>>, vector<1x128xf32>,
    %c0_4 = arith.constant 0 : index
    %c0_5 = arith.constant 0 : index
    %4 = vector.load %arg4[%c0_4, %c0_5] : memref<8x1xf32, #tpu.memory_space<vmem>>, vector<8x1xf32>
    %c0_6 = arith.constant 0 : index
    %c0_7 = arith.constant 0 : index
    %5 = vector.load %arg3[%c0_6, %c0_7] : memref<8x1xf32, #tpu.memory_space<vmem>>, vector<8x1xf32>
    %6 = arith.addf %5, %5 : vector<8x1xf32>
    %c0_8 = arith.constant 0 : index
    %c0_9 = arith.constant 0 : index
    %7 = vector.load %arg5[%c0_8, %c0_9] : memref<8x1xf32, #tpu.memory_space<vmem>>, vector<8x1xf32>
    %8 = vector.shape_cast %5 : vector<8x1xf32> to vector<1x8x1xf32>
    %cst_10 = arith.constant dense<0.000000e+00> : vector<1xf32>
    %9 = vector.multi_reduction <add>, %8, %cst_10 [1, 2] : vector<1x8x1xf32> to vector<1xf32>
    %10 = vector.shape_cast %9 : vector<1xf32> to vector<1x1x1xf32>
    %11 = vector.extract %10[0, 0, 0] : f32 from vector<1x1x1xf32>
    %12 = arith.addf %11, %11 : f32
    %13 = arith.index_cast %arg0 : i32 to index
    %14 = memref.load %arg1[%13] : memref<1xi32, #tpu.memory_space<smem>>
    %15 = arith.index_cast %arg0 : i32 to index
    %16 = memref.load %arg2[%15] : memref<1xi32, #tpu.memory_space<smem>>
    %c0_i32 = arith.constant 0 : i32
    %c1_i32 = arith.constant 1 : i32
    %17 = arith.subi %c1_i32, %14 : i32
    %18 = arith.addi %14, %17 : i32
    %c1_i32_11 = arith.constant 1 : i32
    scf.for %arg11 = %14 to %18 step %c1_i32_11  : i32 {
      %25 = arith.index_cast %arg11 : i32 to index
      %c0_21 = arith.constant 0 : index
      %c0_22 = arith.constant 0 : index
      %26 = vector.load %arg6[%25, %c0_21, %c0_22] : memref<1x1x128xf32, #tpu.memory_space<vmem>>, vector<1x1x128xf32>
      %27 = vector.shape_cast %26 : vector<1x1x128xf32> to vector<1x128xf32>
      %28 = arith.index_cast %arg11 : i32 to index
      %c0_23 = arith.constant 0 : index
      %c0_24 = arith.constant 0 : index
      %29 = vector.load %arg7[%28, %c0_23, %c0_24] : memref<1x1x128xf32, #tpu.memory_space<vmem>>, vector<1x1x128xf32>
      %30 = vector.shape_cast %29 : vector<1x1x128xf32> to vector<1x128xf32>
      %31 = vector.broadcast %30 : vector<1x128xf32> to vector<8x128xf32>
      %32 = vector.broadcast %7 : vector<8x1xf32> to vector<8x128xf32>
      %33 = arith.subf %31, %32 : vector<8x128xf32>
      %34 = math.tanh %33 : vector<8x128xf32>
      %35 = arith.cmpi sge, %arg11, %16 : i32
      %c0_i32_25 = arith.constant 0 : i32
      %36 = arith.cmpi slt, %arg11, %c0_i32_25 : i32
      %37 = arith.andi %35, %36 : i1
      %38 = arith.extui %37 : i1 to i32
      %c0_i32_26 = arith.constant 0 : i32
      %39 = arith.cmpi ne, %38, %c0_i32_26 : i32
      scf.if %39 {
        %c0_28 = arith.constant 0 : index
        %c0_29 = arith.constant 0 : index
        %43 = vector.load %arg9[%c0_28, %c0_29] : memref<1x128xf32, #tpu.memory_space<vmem>>, vector<1x128xf32>
        %44 = vector.broadcast %12 : f32 to vector<1x128xf32>
        %45 = arith.addf %43, %44 : vector<1x128xf32>
        %c0_30 = arith.constant 0 : index
        %c0_31 = arith.constant 0 : index
        %46 = vector.load %arg9[%c0_30, %c0_31] : memref<1x128xf32, #tpu.memory_space<vmem>>, vector<1x128xf32>
        tpu.vector_store %arg9[%c0_30, %c0_31], %45 {strides = array<i32>} : memref<1x128xf32, #tpu.memory_space<vmem>>, vector<1x128xf32>,
        %c0_32 = arith.constant 0 : index
        %c0_33 = arith.constant 0 : index
        %47 = vector.load %arg10[%c0_32, %c0_33] : memref<1x128xf32, #tpu.memory_space<vmem>>, vector<1x128xf32>
        %48 = vector.broadcast %6 : vector<8x1xf32> to vector<8x128xf32>
        %49 = arith.mulf %48, %34 : vector<8x128xf32>
        %cst_34 = arith.constant dense<0.000000e+00> : vector<128xf32>
        %50 = vector.multi_reduction <add>, %49, %cst_34 [0] : vector<8x128xf32> to vector<128xf32>
        %51 = vector.shape_cast %50 : vector<128xf32> to vector<1x128xf32>
        %52 = arith.addf %47, %51 : vector<1x128xf32>
        %c0_35 = arith.constant 0 : index
        %c0_36 = arith.constant 0 : index
        %53 = vector.load %arg10[%c0_35, %c0_36] : memref<1x128xf32, #tpu.memory_space<vmem>>, vector<1x128xf32>
        tpu.vector_store %arg10[%c0_35, %c0_36], %52 {strides = array<i32>} : memref<1x128xf32, #tpu.memory_space<vmem>>, vector<1x128xf32>,
      } else {
      }
      %true = arith.constant true
      %40 = arith.xori %37, %true : i1
      %41 = arith.extui %40 : i1 to i32
      %c0_i32_27 = arith.constant 0 : i32
      %42 = arith.cmpi ne, %41, %c0_i32_27 : i32
      scf.if %42 {
        %43 = vector.broadcast %4 : vector<8x1xf32> to vector<8x128xf32>
        %44 = vector.broadcast %27 : vector<1x128xf32> to vector<8x128xf32>
        %45 = arith.cmpf olt, %43, %44 : vector<8x128xf32>
        %46 = vector.broadcast %4 : vector<8x1xf32> to vector<8x128xf32>
        %47 = vector.broadcast %27 : vector<1x128xf32> to vector<8x128xf32>
        %48 = arith.cmpf oeq, %46, %47 : vector<8x128xf32>
        %cst_28 = arith.constant 0.000000e+00 : f32
        %49 = vector.shape_cast %5 : vector<8x1xf32> to vector<8x1xf32>
        %50 = vector.broadcast %49 : vector<8x1xf32> to vector<8x128xf32>
        %51 = vector.broadcast %cst_28 : f32 to vector<8x128xf32>
        %52 = arith.select %48, %50, %51 : vector<8x128xi1>, vector<8x128xf32>
        %53 = vector.shape_cast %6 : vector<8x1xf32> to vector<8x1xf32>
        %54 = vector.broadcast %53 : vector<8x1xf32> to vector<8x128xf32>
        %55 = arith.select %45, %54, %52 : vector<8x128xi1>, vector<8x128xf32>
        %c0_29 = arith.constant 0 : index
        %c0_30 = arith.constant 0 : index
        %56 = vector.load %arg9[%c0_29, %c0_30] : memref<1x128xf32, #tpu.memory_space<vmem>>, vector<1x128xf32>
        %cst_31 = arith.constant dense<0.000000e+00> : vector<128xf32>
        %57 = vector.multi_reduction <add>, %55, %cst_31 [0] : vector<8x128xf32> to vector<128xf32>
        %58 = vector.shape_cast %57 : vector<128xf32> to vector<1x128xf32>
        %59 = arith.addf %56, %58 : vector<1x128xf32>
        %c0_32 = arith.constant 0 : index
        %c0_33 = arith.constant 0 : index
        %60 = vector.load %arg9[%c0_32, %c0_33] : memref<1x128xf32, #tpu.memory_space<vmem>>, vector<1x128xf32>
        tpu.vector_store %arg9[%c0_32, %c0_33], %59 {strides = array<i32>} : memref<1x128xf32, #tpu.memory_space<vmem>>, vector<1x128xf32>,
        %c0_34 = arith.constant 0 : index
        %c0_35 = arith.constant 0 : index
        %61 = vector.load %arg10[%c0_34, %c0_35] : memref<1x128xf32, #tpu.memory_space<vmem>>, vector<1x128xf32>
        %62 = arith.mulf %55, %34 : vector<8x128xf32>
        %cst_36 = arith.constant dense<0.000000e+00> : vector<128xf32>
        %63 = vector.multi_reduction <add>, %62, %cst_36 [0] : vector<8x128xf32> to vector<128xf32>
        %64 = vector.shape_cast %63 : vector<128xf32> to vector<1x128xf32>
        %65 = arith.addf %61, %64 : vector<1x128xf32>
        %c0_37 = arith.constant 0 : index
        %c0_38 = arith.constant 0 : index
        %66 = vector.load %arg10[%c0_37, %c0_38] : memref<1x128xf32, #tpu.memory_space<vmem>>, vector<1x128xf32>
        tpu.vector_store %arg10[%c0_37, %c0_38], %65 {strides = array<i32>} : memref<1x128xf32, #tpu.memory_space<vmem>>, vector<1x128xf32>,
      } else {
      }
    }
    %c0_12 = arith.constant 0 : index
    %c0_13 = arith.constant 0 : index
    %19 = vector.load %arg9[%c0_12, %c0_13] : memref<1x128xf32, #tpu.memory_space<vmem>>, vector<1x128xf32>
    %20 = vector.shape_cast %19 : vector<1x128xf32> to vector<1x1x128xf32>
    %c0_14 = arith.constant 0 : index
    %c0_15 = arith.constant 0 : index
    %c0_16 = arith.constant 0 : index
    %21 = vector.load %arg8[%c0_14, %c0_15, %c0_16] : memref<1x2x128xf32, #tpu.memory_space<vmem>>, vector<1x1x128xf32>
    tpu.vector_store %arg8[%c0_14, %c0_15, %c0_16], %20 {strides = array<i32>} : memref<1x2x128xf32, #tpu.memory_space<vmem>>, vector<1x1x128xf32>,
    %c0_17 = arith.constant 0 : index
    %c0_18 = arith.constant 0 : index
    %22 = vector.load %arg10[%c0_17, %c0_18] : memref<1x128xf32, #tpu.memory_space<vmem>>, vector<1x128xf32>
    %23 = vector.shape_cast %22 : vector<1x128xf32> to vector<1x1x128xf32>
    %c0_19 = arith.constant 0 : index
    %c1 = arith.constant 1 : index
    %c0_20 = arith.constant 0 : index
    %24 = vector.load %arg8[%c0_19, %c1, %c0_20] : memref<1x2x128xf32, #tpu.memory_space<vmem>>, vector<1x1x128xf32>
    tpu.vector_store %arg8[%c0_19, %c1, %c0_20], %23 {strides = array<i32>} : memref<1x2x128xf32, #tpu.memory_space<vmem>>, vector<1x1x128xf32>,
    return
  }
  func.func @transform_0(%arg0: i32, %arg1: memref<1xi32, #tpu.memory_space<smem>>, %arg2: memref<1xi32, #tpu.memory_space<smem>>) -> (i32, i32) {
    %c0_i32 = arith.constant 0 : i32
    %c0_i32_0 = arith.constant 0 : i32
    return %arg0, %c0_i32 : i32, i32
  }
  func.func @transform_1(%arg0: i32, %arg1: memref<1xi32, #tpu.memory_space<smem>>, %arg2: memref<1xi32, #tpu.memory_space<smem>>) -> (i32, i32) {
    %c0_i32 = arith.constant 0 : i32
    %c0_i32_0 = arith.constant 0 : i32
    return %arg0, %c0_i32 : i32, i32
  }
  func.func @transform_2(%arg0: i32, %arg1: memref<1xi32, #tpu.memory_space<smem>>, %arg2: memref<1xi32, #tpu.memory_space<smem>>) -> (i32, i32) {
    %c0_i32 = arith.constant 0 : i32
    %c0_i32_0 = arith.constant 0 : i32
    return %arg0, %c0_i32 : i32, i32
  }
  func.func @transform_3(%arg0: i32, %arg1: memref<1xi32, #tpu.memory_space<smem>>, %arg2: memref<1xi32, #tpu.memory_space<smem>>) -> (i32, i32, i32) {
    %c0_i32 = arith.constant 0 : i32
    %c0_i32_0 = arith.constant 0 : i32
    %c0_i32_1 = arith.constant 0 : i32
    %c0_i32_2 = arith.constant 0 : i32
    return %c0_i32, %c0_i32_0, %c0_i32_1 : i32, i32, i32
  }
  func.func @transform_4(%arg0: i32, %arg1: memref<1xi32, #tpu.memory_space<smem>>, %arg2: memref<1xi32, #tpu.memory_space<smem>>) -> (i32, i32, i32) {
    %c0_i32 = arith.constant 0 : i32
    %c0_i32_0 = arith.constant 0 : i32
    %c0_i32_1 = arith.constant 0 : i32
    %c0_i32_2 = arith.constant 0 : i32
    return %c0_i32, %c0_i32_0, %c0_i32_1 : i32, i32, i32
  }
  func.func @transform_5(%arg0: i32, %arg1: memref<1xi32, #tpu.memory_space<smem>>, %arg2: memref<1xi32, #tpu.memory_space<smem>>) -> (i32, i32, i32) {
    %c0_i32 = arith.constant 0 : i32
    %c0_i32_0 = arith.constant 0 : i32
    %c0_i32_1 = arith.constant 0 : i32
    return %arg0, %c0_i32, %c0_i32_0 : i32, i32, i32
  }
}

</mosaic_0001>

<bundles_post_ra>
// kernel: tpu_custom_call.1
= control target key start
LH: loop header
LB: loop body
LE: loop exit
PB: predicated region body
PF: predicated region fallthrough
CT: control target
= control target key end

     0   :  { %14 = vsyncpa [#allocation8], 0  ;;  %vm31_vm0 = vcmask 7168   ;;  %v218_v2 = vmov 0.0   ;;  %s333_s0 = inlined_call_operand.<no memory space> [shape: s32[1], index: 0, kind: input, shape index: {}]   ;;  %s334_s1 = inlined_call_operand.<no memory space> [shape: s32[1], index: 1, kind: input, shape index: {}]   ;;  %s335_s2 = inlined_call_operand.vmem [shape: f32[8,1], index: 2, kind: input, shape index: {}]   ;;  %s336_s3 = inlined_call_operand.vmem [shape: f32[8,1], index: 3, kind: input, shape index: {}]   ;;  %s337_s4 = inlined_call_operand.vmem [shape: f32[8,1], index: 4, kind: input, shape index: {}]   ;;  %s338_s5 = inlined_call_operand.vmem [shape: f32[1,1,128], index: 5, kind: input, shape index: {}]   ;;  %s339_s6 = inlined_call_operand.vmem [shape: f32[1,1,128], index: 6, kind: input, shape index: {}]   ;;  %s340_s7 = inlined_call_operand.hbm [shape: f32[1,2,128], index: 7, kind: output, shape index: {}]  }
   0x1   :  { %v266_v0 = vld [vmem:[%s336_s3] sm:$0xff]  ;;  %25 = vst [vmem:[#allocation2] sm:$0x1] %v218_v2  ;;  %26 = vst [vmem:[#allocation3] sm:$0x1] %v218_v2  ;;  %p161_p0 = scmp.ge.s32.totalorder %s333_s0, 1 }
   0x2   :  { %v271_v1 = vld [vmem:[%s335_s2] sm:$0xff] }
   0x3   :  { %v275_v3 = vadd.f32 %v271_v1, %v271_v1  ;;  %v280_v4 = vld [vmem:[%s337_s4] sm:$0xff]  ;;  %v32_v5 = vsel %vm31_vm0, %v271_v1, 0.0 }
   0x4   :  { %33 = vadd.xlane.f32.xlu0 %v32_v5 }
  0x8d   :  { %v34_v6 = vpop.xlane.xlu0 %33 }
  0x8e   :  { %v35_v7 = vrot.slane %v34_v6, 4 }
  0x90   :  { %v36_v8 = vadd.f32 %v35_v7, %v34_v6 }
  0x92   :  { %v37_v9 = vrot.slane %v36_v8, 2 }
  0x94   :  { %v38_v10 = vadd.f32 %v37_v9, %v36_v8 }
  0x96   :  { %v39_v11 = vrot.slane %v38_v10, 1 }
  0x98   :  { %v40_v12 = vadd.f32 %v39_v11, %v38_v10 }
  0x9a   :  { %167 = vpush %v40_v12 }
  0xc8   :  { %162 = sbr.rel (%p161_p0) target bundleno = 647 (0x287), region = 51 }
  0xcb   :  { %s283_s2 = spop %167 }
  0xcc   :  { %s42_s3 = sadd.f32 %s283_s2, %s283_s2 }
  0xcd LB: > { %v219_v13 = vmov 0   ;;  %s51_s12 = scalar_lea.vmem %s338_s5, %s216_s0  ;;  %p68_p1 = scmp.ge.s32.totalorder %s216_s0, %s334_s1  ;;  %s216_s0 = sphi %s333_s0, %s48_s0  }
  0xce   : > { %182 = vset.pattern.permute.xlu0 %v219_v13  ;;  %v166_v14 = vld [vmem:[%s51_s12] ss:$0 sm:$0xff]  ;;  %p69_p2 = scmp.lt.s32.totalorder %s216_s0, 0  ;;  %s53_s18 = scalar_lea.vmem %s339_s6, %s216_s0 }
  0xcf   : > { %63 = vperm.xlu0 %182, %v280_v4   ;;  %v165_v15 = vld [vmem:[%s53_s18] ss:$0 sm:$0xff] }
  0xd0   : > { %p308_p3 = pnand %p69_p2, %p68_p1 }
 0x14a   : > { %v64_v16 = vpop.permute.xlu0 %63 }
 0x14b   : > { %v66_v17 = vsub.f32 %v165_v15, %v64_v16 }
 0x14d   : > { %183 = vtanh.f32 %v66_v17 }
 0x156   : > { %73 = sbr.rel (%p308_p3) target bundleno = 490 (0x1ea), region = 32 }
 0x15a   : > { %v184_v18 = vpop.eup %183 }
 0x15b   : > { %v220_v19 = vmov 0   ;;  %v74_v20 = vld [vmem:[#allocation2] sm:$0x1]  ;;  %v75_v21 = vstv %s42_s3  ;;  %v78_v30 = vld [vmem:[#allocation3] sm:$0x1] }
 0x15c   : > { %185 = vset.pattern.permute.xlu0 %v220_v19  ;;  %v76_v22 = vadd.f32 %v75_v21, %v74_v20 }
 0x15d   : > { %81 = vperm.xlu0 %185, %v275_v3  }
 0x15e   : > { %77 = vst [vmem:[#allocation2] sm:$0x1] %v76_v22 }
 0x1d8   : > { %v82_v23 = vpop.permute.xlu0 %81 }
 0x1d9   : > { %v84_v24 = vmul.f32 %v184_v18, %v82_v23 }
 0x1db   : > { %v85_v25 = vrot.slane %v84_v24, 4 }
 0x1dd   : > { %v86_v26 = vadd.f32 %v85_v25, %v84_v24 }
 0x1df   : > { %v87_v27 = vrot.slane %v86_v26, 2 }
 0x1e1   : > { %v88_v28 = vadd.f32 %v87_v27, %v86_v26 }
 0x1e3   : > { %v89_v29 = vrot.slane %v88_v28, 1 }
 0x1e5   : > { %v90_v31 = vadd.f32 %v89_v29, %v88_v28 }
 0x1e7   : > { %v91_v32 = vadd.f32 %v90_v31, %v78_v30 }
 0x1e9   : > { %92 = vst [vmem:[#allocation3] sm:$0x1] %v91_v32 }
 0x1ea PF: > { %95 = sbr.rel (!%p308_p3) target bundleno = 639 (0x27f), region = 36  ;;  %v221_v33 = vmov (%p308_p3), 0   ;;  %v121_v49 = vld [vmem:[#allocation2] sm:$0x1] (%p308_p3) }
 0x1eb   : > { %186 = vset.pattern.permute.xlu0 (%p308_p3), %v221_v33  ;;  %187 = vset.pattern.permute.xlu1 (%p308_p3), %v221_v33 }
 0x1ec   : > { %98 = vperm.xlu0 (%p308_p3), %186, %v266_v0   ;;  %117 = vperm.xlu1 (%p308_p3), %187, %v275_v3  }
 0x1f0   : > { %111 = vperm.xlu0 %186, %v271_v1   ;;  %v130_v52 = vld [vmem:[#allocation3] sm:$0x1] }
 0x267   : > { %v99_v34 = vpop.permute.xlu0 %98  ;;  %v118_v35 = vpop.permute.xlu1 %117 }
 0x268   : > { %vm108_vm1 = vcmp.eq.f32.partialorder %v99_v34, %v166_v14  ;;  %vm107_vm2 = vcmp.lt.f32.partialorder %v99_v34, %v166_v14 }
 0x26b   : > { %v112_v36 = vpop.permute.xlu0 %111 }
 0x26c   : > { %v114_v37 = vsel %vm108_vm1, %v112_v36, 0.0 }
 0x26d   : > { %v120_v38 = vsel %vm107_vm2, %v118_v35, %v114_v37 }
 0x26e   : > { %v122_v39 = vrot.slane %v120_v38, 4  ;;  %v131_v40 = vmul.f32 %v184_v18, %v120_v38 }
 0x270   : > { %v123_v41 = vadd.f32 %v122_v39, %v120_v38  ;;  %v132_v42 = vrot.slane %v131_v40, 4 }
 0x272   : > { %v124_v43 = vrot.slane %v123_v41, 2  ;;  %v133_v44 = vadd.f32 %v132_v42, %v131_v40 }
 0x274   : > { %v125_v45 = vadd.f32 %v124_v43, %v123_v41  ;;  %v134_v46 = vrot.slane %v133_v44, 2 }
 0x276   : > { %v126_v47 = vrot.slane %v125_v45, 1  ;;  %v135_v48 = vadd.f32 %v134_v46, %v133_v44 }
 0x278   : > { %v127_v50 = vadd.f32 %v126_v47, %v125_v45  ;;  %v136_v51 = vrot.slane %v135_v48, 1 }
 0x27a   : > { %v128_v53 = vadd.f32 %v127_v50, %v121_v49  ;;  %v137_v54 = vadd.f32 %v136_v51, %v135_v48 }
 0x27c   : > { %129 = vst [vmem:[#allocation2] sm:$0x1] %v128_v53  ;;  %v138_v55 = vadd.f32 %v137_v54, %v130_v52 }
 0x27e   : > { %139 = vst [vmem:[#allocation3] sm:$0x1] %v138_v55 }
 0x27f PF: > { %s48_s0 = sadd.s32 1, %s216_s0  }
 0x280   : > { %p47_p4 = scmp.ge.s32.totalorder %s48_s0, 1 }
 0x282   :  { %50 = sbr.rel (!%p47_p4) target bundleno = 205 (0xcd), region = 57 }
 0x287 PF:  { %v140_v56 = vld [vmem:[#allocation2] sm:$0x1]  ;;  %v142_v57 = vld [vmem:[#allocation3] sm:$0x1]  ;;  %s222_s19 = smov [#allocation7]  }
 0x288   :  { %141 = vst [vmem:[#allocation7] sm:$0x1] %v140_v56  ;;  %143 = vst [vmem:[#allocation7 + $0x1] sm:$0x1] %v142_v57  ;;  %s150_s20 = sshll.u32 %s222_s19, 4  ;;  %s151_s20 = int_to_ptr.vmem [resolvable:$true] %s150_s20 }
 0x289   :  { %s188_s21 = scalar_lea.vmem %s151_s20, 32  ;;  %p193_p6 = scmp.lt.s32.totalorder %s151_s20, %s151_s20 }
 0x28a   :  { %p189_p5 = scmp.ne.s32.totalorder %s151_s20, %s188_s21  ;;  %p194_p7 = scmp.lt.s32.totalorder %s188_s21, %s188_s21 }
 0x28c   :  { %p195_p8 = por %p194_p7, %p193_p6 }
 0x28e   :  { %p196_p9 = pnand %p195_p8, %p189_p5 }
 0x290   :  { %199 = shalt.err (!%p196_p9)
}
 0x291   :  { %153 = dma.vmem_to_hbm [thread:$0]  %s151_s20, 32, %s340_s7, [#allocation8]  }
 0x292   :  { %212 = dma.done.wait [#allocation8], 32  }
 0x293   :  { %213 = vsyncadd [#allocation8], 4294967264 }
 0x294   :  { %157 = vsyncpa [#allocation8], 1 }

</bundles_post_ra>
